<compile_context>
chip_gen: v7x
topology: tpu7x:2x2x1
jax: 0.10.0
libtpu: 0.0.40
codegen_flags: <defaults>
</compile_context>

<pallas_src>
import functools

import jax
import jax.numpy as jnp
from jax.experimental import pallas as pl
from jax.experimental.pallas import tpu as pltpu

_BIG = 1.0e12
_MAX_TR = 1024                 # row-axis tile cap (multiple of 8)
_TARGET_ROW_TILES = 2          # expose >=2 row tiles so v7x megacore is used
_F32_TEMP_BYTES = 24           # ~6 live f32 temporaries / element (cost model)


def _vmem_budget():
    """Generation-aware VMEM sizing: (per-tile byte budget, scoped VMEM limit)."""
    cap = 64 * 1024 * 1024     # conservative fallback (v7x per-core VMEM)
    try:
        info_fn = getattr(pltpu, "get_tpu_info", None)
        if info_fn is not None:
            cap = int(getattr(info_fn(), "vmem_capacity_bytes", cap))
    except Exception:
        pass
    return cap // 2, (cap * 3) // 4


def _pick_tr(n_rows):
    """Row tile: divide n_rows evenly (mask compiled out) with >=2 tiles if possible."""
    if n_rows > _MAX_TR:
        return _MAX_TR                          # ragged edge handled by row mask
    if n_rows % 8 == 0 and n_rows >= 8 * _TARGET_ROW_TILES:
        for k in range(_TARGET_ROW_TILES, n_rows // 8 + 1):
            if n_rows % k == 0 and (n_rows // k) % 8 == 0:
                return n_rows // k              # even split into k parallel tiles
    return n_rows                               # single full-height tile


def _pick_tc(n_cls, max_tc):
    """Class tile: full width if it fits, else a 128-multiple that divides n_cls."""
    if n_cls <= max_tc:
        return n_cls
    t = max(128, (max_tc // 128) * 128)
    lo = max(128, t // 2)
    c = t
    while c >= lo:
        if n_cls % c == 0:
            return c                            # even split -> no edge mask
        c -= 128
    return t                                    # ragged edge handled by col mask


def _mlcc_kernel(yp_ref, yt_ref, out_ref, m_pos, s_pos, m_neg, s_neg,
                 *, n_rows, n_cls, tr, tc):
    i = pl.program_id(0)       # row tile     ("parallel")
    j = pl.program_id(1)       # class tile   ("arbitrary", innermost reduction)

    # Online-logsumexp state: m = running max, s = running sum of exp(z - m).
    # m=0 / s=1 encodes the implicit appended zero column of the reference.
    @pl.when(j == 0)
    def _():
        m_pos[...] = jnp.zeros_like(m_pos)
        s_pos[...] = jnp.ones_like(s_pos)
        m_neg[...] = jnp.zeros_like(m_neg)
        s_neg[...] = jnp.ones_like(s_neg)

    yp = yp_ref[...].astype(jnp.float32)        # (tr, tc), cast after the DMA
    yt = yt_ref[...].astype(jnp.float32)

    is_pos = yt > 0.5                           # y_true is strictly {0, 1}

    # Ragged-edge masks.  Compiled out entirely when tr | n_rows and tc | n_cls
    # (tile selection tries hard to make that true).
    valid = None
    if n_rows % tr:
        ridx = i * tr + jax.lax.broadcasted_iota(jnp.int32, (tr, tc), 0)
        valid = ridx < n_rows
    if n_cls % tc:
        cidx = j * tc + jax.lax.broadcasted_iota(jnp.int32, (tr, tc), 1)
        cvalid = cidx < n_cls
        valid = cvalid if valid is None else (valid & cvalid)
    pos_sel = is_pos if valid is None else (is_pos & valid)
    neg_sel = (~is_pos) if valid is None else ((~is_pos) & valid)

    neg_yp = -yp
    z_pos = jnp.where(pos_sel, neg_yp, -_BIG)   # positive-class logits only
    z_neg = jnp.where(neg_sel, yp, -_BIG)       # negative-class logits only

    m_pos_old = m_pos[...]                      # (tr, 1)
    m_neg_old = m_neg[...]
    m_pos_new = jnp.maximum(m_pos_old, jnp.max(z_pos, axis=-1, keepdims=True))
    m_neg_new = jnp.maximum(m_neg_old, jnp.max(z_neg, axis=-1, keepdims=True))

    # Select-routed single exp: one EUP exp per element instead of two while
    # keeping separate per-class shifts (no shared-exp underflow risk).
    t = jnp.where(pos_sel, neg_yp - m_pos_new, yp - m_neg_new)
    if valid is not None:
        t = jnp.where(valid, t, -_BIG)          # garbage edge elems -> exp == 0
    e = jnp.exp(t)
    p = jnp.where(pos_sel, e, 0.0)

    sum_e = jnp.sum(e, axis=-1, keepdims=True)
    sum_p = jnp.sum(p, axis=-1, keepdims=True)

    s_pos[...] = s_pos[...] * jnp.exp(m_pos_old - m_pos_new) + sum_p
    s_neg[...] = s_neg[...] * jnp.exp(m_neg_old - m_neg_new) + (sum_e - sum_p)
    m_pos[...] = m_pos_new
    m_neg[...] = m_neg_new

    @pl.when(j == pl.num_programs(1) - 1)
    def _():
        row_loss = (m_pos[...] + jnp.log(s_pos[...])
                    + m_neg[...] + jnp.log(s_neg[...]))             # (tr, 1)
        # Rows past n_rows (masked) contribute exactly 0.
        out_ref[...] = jnp.broadcast_to(jnp.sum(row_loss), out_ref.shape)


def my_loss_ner(y_pred, y_true, *, _force_tr=None, _force_tc=None):
    """Pallas equivalent of MyLossNer.forward(y_pred, y_true) -> scalar f32.

    Inputs may be f32 or bf16 (y_true is {0,1}; bf16 y_pred halves HBM bytes in
    this mem-bound kernel).  All math runs in f32 after the load.
    """
    b, h = y_pred.shape[0], y_pred.shape[1]
    yp = y_pred.reshape(b * h, -1)              # free reshape; no astype / pad
    yt = y_true.reshape(b * h, -1)
    n_rows, n_cls = yp.shape

    tile_budget, vmem_limit = _vmem_budget()
    tr = _force_tr if _force_tr is not None else _pick_tr(n_rows)
    # Per-element VMEM cost: double-buffered input blocks + live f32 temporaries.
    elem_cost = 2 * (yp.dtype.itemsize + yt.dtype.itemsize) + _F32_TEMP_BYTES
    max_tc = max(128, (tile_budget // (tr * elem_cost)) // 128 * 128)
    tc = _force_tc if _force_tc is not None else _pick_tc(n_cls, max_tc)

    n_rt = pl.cdiv(n_rows, tr)
    n_ct = pl.cdiv(n_cls, tc)

    kernel = functools.partial(_mlcc_kernel, n_rows=n_rows, n_cls=n_cls,
                               tr=tr, tc=tc)

    # TODO(synk): if xprof shows exposed DMA after the single-exp change, sweep
    # pipeline_mode=pl.Buffered(3) on the two in_specs (VMEM budget permitting).
    partials = pl.pallas_call(
        kernel,
        out_shape=jax.ShapeDtypeStruct((n_rt, 8, 128), jnp.float32),
        grid_spec=pltpu.PrefetchScalarGridSpec(
            num_scalar_prefetch=0,
            grid=(n_rt, n_ct),
            in_specs=[
                pl.BlockSpec((tr, tc), lambda i, j: (i, j)),
                pl.BlockSpec((tr, tc), lambda i, j: (i, j)),
            ],
            out_specs=pl.BlockSpec((1, 8, 128), lambda i, j: (i, 0, 0)),
            scratch_shapes=[pltpu.VMEM((tr, 1), jnp.float32)] * 4,
        ),
        compiler_params=pltpu.CompilerParams(
            dimension_semantics=("parallel", "arbitrary"),
            vmem_limit_bytes=int(vmem_limit),
        ),
    )(yp, yt)

    return jnp.sum(partials[:, 0, 0]) / jnp.float32(n_rows)


def _reference(y_pred, y_true):
    """Pure-JAX reference mirroring the PyTorch module (for verification)."""
    b, h = y_pred.shape[0], y_pred.shape[1]
    yt = y_true.reshape(b * h, -1).astype(jnp.float32)
    yp = y_pred.reshape(b * h, -1).astype(jnp.float32)
    z = (1.0 - 2.0 * yt) * yp
    z_pos = z - (1.0 - yt) * _BIG
    z_neg = z - yt * _BIG
    zeros = jnp.zeros_like(z[..., :1])
    pos = jax.scipy.special.logsumexp(jnp.concatenate([z_pos, zeros], -1), axis=-1)
    neg = jax.scipy.special.logsumexp(jnp.concatenate([z_neg, zeros], -1), axis=-1)
    return jnp.mean(pos + neg)


if __name__ == "__main__":
    key = jax.random.PRNGKey(0)
    ks = jax.random.split(key, 8)

    # 1) (batch, heads, seq, seq) GlobalPointer-style logits / {0,1} labels.
    #    n_rows = 16 -> two 8-row tiles (exercises the parallel row split).
    batch, heads, seq = 4, 4, 8
    y_pred = jax.random.normal(ks[0], (batch, heads, seq, seq), jnp.float32) * 3.0
    y_true = (jax.random.uniform(ks[1], (batch, heads, seq, seq)) < 0.1).astype(jnp.float32)
    loss = jax.block_until_ready(my_loss_ner(y_pred, y_true))
    ref = jax.block_until_ready(_reference(y_pred, y_true))
    assert jnp.allclose(loss, ref, rtol=1e-4, atol=1e-5), (loss, ref)

    # 2) Forced class tiling with an evenly dividing tile (n_cls = 9216, tc = 1152
    #    -> 8 column tiles, no edge mask): exercises the online logsumexp sweep.
    b2, h2, s2 = 2, 3, 96
    yp2 = jax.random.normal(ks[2], (b2, h2, s2, s2), jnp.float32) * 3.0
    yt2 = (jax.random.uniform(ks[3], (b2, h2, s2, s2)) < 0.05).astype(jnp.float32)
    loss2 = jax.block_until_ready(my_loss_ner(yp2, yt2, _force_tc=1152))
    ref2 = jax.block_until_ready(_reference(yp2, yt2))
    assert jnp.allclose(loss2, ref2, rtol=1e-4, atol=1e-4), (loss2, ref2)

    # 3) Ragged column edge (n_cls = 400, tc = 256 -> second tile masked).
    b3, h3, s3 = 2, 5, 20
    yp3 = jax.random.normal(ks[4], (b3, h3, s3, s3), jnp.float32) * 3.0
    yt3 = (jax.random.uniform(ks[5], (b3, h3, s3, s3)) < 0.1).astype(jnp.float32)
    loss3 = jax.block_until_ready(my_loss_ner(yp3, yt3, _force_tc=256))
    ref3 = jax.block_until_ready(_reference(yp3, yt3))
    assert jnp.allclose(loss3, ref3, rtol=1e-4, atol=1e-4), (loss3, ref3)

    # 4) bf16 inputs (half the HBM bytes); compare against the f32 reference.
    yp4 = (jax.random.normal(ks[6], (2, 4, 8, 8), jnp.float32) * 3.0).astype(jnp.bfloat16)
    yt4 = (jax.random.uniform(ks[7], (2, 4, 8, 8)) < 0.1).astype(jnp.bfloat16)
    loss4 = jax.block_until_ready(my_loss_ner(yp4, yt4))
    ref4 = jax.block_until_ready(
        _reference(yp4.astype(jnp.float32), yt4.astype(jnp.float32)))
    assert jnp.allclose(loss4, ref4, rtol=3e-2, atol=1e-2), (loss4, ref4)

    print("KERNEL_OK")
</pallas_src>

<mosaic_0001>
module attributes {stable_mosaic.version = 11 : i64} {
  func.func @_mlcc_kernel(%arg0: i32, %arg1: i32, %arg2: memref<8x64xf32, #tpu.memory_space<vmem>>, %arg3: memref<8x64xf32, #tpu.memory_space<vmem>>, %arg4: memref<1x8x128xf32, #tpu.memory_space<vmem>>, %arg5: memref<8x1xf32, #tpu.memory_space<vmem>>, %arg6: memref<8x1xf32, #tpu.memory_space<vmem>>, %arg7: memref<8x1xf32, #tpu.memory_space<vmem>>, %arg8: memref<8x1xf32, #tpu.memory_space<vmem>>) attributes {dimension_semantics = [#tpu.dimension_semantics<parallel>, #tpu.dimension_semantics<arbitrary>], iteration_bounds = array<i64: 2, 1>, scalar_prefetch = 0 : i64, scratch_operands = 4 : i64, tpu.core_type = #tpu.core_type<tc>, window_params = [{transform_indices = @transform_0, window_bounds = array<i64: 8, 64>}, {transform_indices = @transform_1, window_bounds = array<i64: 8, 64>}, {transform_indices = @transform_2, window_bounds = array<i64: 1, 8, 128>}]} {
    %c0_i32 = arith.constant 0 : i32
    %0 = arith.cmpi eq, %arg1, %c0_i32 : i32
    %1 = arith.extui %0 : i1 to i32
    %c0_i32_0 = arith.constant 0 : i32
    %2 = arith.cmpi ne, %1, %c0_i32_0 : i32
    scf.if %2 {
      %cst_31 = arith.constant 0.000000e+00 : f32
      %52 = vector.broadcast %cst_31 : f32 to vector<8x1xf32>
      %c0_32 = arith.constant 0 : index
      %c0_33 = arith.constant 0 : index
      %53 = vector.load %arg5[%c0_32, %c0_33] : memref<8x1xf32, #tpu.memory_space<vmem>>, vector<8x1xf32>
      tpu.vector_store %arg5[%c0_32, %c0_33], %52 {strides = array<i32>} : memref<8x1xf32, #tpu.memory_space<vmem>>, vector<8x1xf32>,
      %cst_34 = arith.constant 1.000000e+00 : f32
      %54 = vector.broadcast %cst_34 : f32 to vector<8x1xf32>
      %c0_35 = arith.constant 0 : index
      %c0_36 = arith.constant 0 : index
      %55 = vector.load %arg6[%c0_35, %c0_36] : memref<8x1xf32, #tpu.memory_space<vmem>>, vector<8x1xf32>
      tpu.vector_store %arg6[%c0_35, %c0_36], %54 {strides = array<i32>} : memref<8x1xf32, #tpu.memory_space<vmem>>, vector<8x1xf32>,
      %cst_37 = arith.constant 0.000000e+00 : f32
      %56 = vector.broadcast %cst_37 : f32 to vector<8x1xf32>
      %c0_38 = arith.constant 0 : index
      %c0_39 = arith.constant 0 : index
      %57 = vector.load %arg7[%c0_38, %c0_39] : memref<8x1xf32, #tpu.memory_space<vmem>>, vector<8x1xf32>
      tpu.vector_store %arg7[%c0_38, %c0_39], %56 {strides = array<i32>} : memref<8x1xf32, #tpu.memory_space<vmem>>, vector<8x1xf32>,
      %cst_40 = arith.constant 1.000000e+00 : f32
      %58 = vector.broadcast %cst_40 : f32 to vector<8x1xf32>
      %c0_41 = arith.constant 0 : index
      %c0_42 = arith.constant 0 : index
      %59 = vector.load %arg8[%c0_41, %c0_42] : memref<8x1xf32, #tpu.memory_space<vmem>>, vector<8x1xf32>
      tpu.vector_store %arg8[%c0_41, %c0_42], %58 {strides = array<i32>} : memref<8x1xf32, #tpu.memory_space<vmem>>, vector<8x1xf32>,
    } else {
    }
    %c0 = arith.constant 0 : index
    %c0_1 = arith.constant 0 : index
    %3 = vector.load %arg2[%c0, %c0_1] : memref<8x64xf32, #tpu.memory_space<vmem>>, vector<8x64xf32>
    %c0_2 = arith.constant 0 : index
    %c0_3 = arith.constant 0 : index
    %4 = vector.load %arg3[%c0_2, %c0_3] : memref<8x64xf32, #tpu.memory_space<vmem>>, vector<8x64xf32>
    %cst = arith.constant 5.000000e-01 : f32
    %5 = vector.broadcast %cst : f32 to vector<8x64xf32>
    %6 = arith.cmpf ogt, %4, %5 : vector<8x64xf32>
    %cst_4 = arith.constant dense<true> : vector<8x64xi1>
    %7 = arith.xori %6, %cst_4 : vector<8x64xi1>
    %cst_5 = arith.constant 0.000000e+00 : f32
    %8 = vector.broadcast %cst_5 : f32 to vector<8x64xf32>
    %9 = arith.subf %8, %3 : vector<8x64xf32>
    %cst_6 = arith.constant -9.99999995E+11 : f32
    %10 = vector.broadcast %cst_6 : f32 to vector<8x64xf32>
    %11 = arith.select %6, %9, %10 : vector<8x64xi1>, vector<8x64xf32>
    %cst_7 = arith.constant -9.99999995E+11 : f32
    %12 = vector.broadcast %cst_7 : f32 to vector<8x64xf32>
    %13 = arith.select %7, %3, %12 : vector<8x64xi1>, vector<8x64xf32>
    %c0_8 = arith.constant 0 : index
    %c0_9 = arith.constant 0 : index
    %14 = vector.load %arg5[%c0_8, %c0_9] : memref<8x1xf32, #tpu.memory_space<vmem>>, vector<8x1xf32>
    %c0_10 = arith.constant 0 : index
    %c0_11 = arith.constant 0 : index
    %15 = vector.load %arg7[%c0_10, %c0_11] : memref<8x1xf32, #tpu.memory_space<vmem>>, vector<8x1xf32>
    %cst_12 = arith.constant dense<0xFF800000> : vector<8xf32>
    %16 = vector.multi_reduction <maximumf>, %11, %cst_12 [1] : vector<8x64xf32> to vector<8xf32>
    %17 = vector.shape_cast %16 : vector<8xf32> to vector<8x1xf32>
    %18 = arith.maximumf %14, %17 : vector<8x1xf32>
    %cst_13 = arith.constant dense<0xFF800000> : vector<8xf32>
    %19 = vector.multi_reduction <maximumf>, %13, %cst_13 [1] : vector<8x64xf32> to vector<8xf32>
    %20 = vector.shape_cast %19 : vector<8xf32> to vector<8x1xf32>
    %21 = arith.maximumf %15, %20 : vector<8x1xf32>
    %22 = vector.broadcast %18 : vector<8x1xf32> to vector<8x64xf32>
    %23 = arith.subf %9, %22 : vector<8x64xf32>
    %24 = vector.broadcast %21 : vector<8x1xf32> to vector<8x64xf32>
    %25 = arith.subf %3, %24 : vector<8x64xf32>
    %26 = arith.select %6, %23, %25 : vector<8x64xi1>, vector<8x64xf32>
    %27 = math.exp %26 : vector<8x64xf32>
    %cst_14 = arith.constant 0.000000e+00 : f32
    %28 = vector.broadcast %cst_14 : f32 to vector<8x64xf32>
    %29 = arith.select %6, %27, %28 : vector<8x64xi1>, vector<8x64xf32>
    %cst_15 = arith.constant dense<0.000000e+00> : vector<8xf32>
    %30 = vector.multi_reduction <add>, %27, %cst_15 [1] : vector<8x64xf32> to vector<8xf32>
    %31 = vector.shape_cast %30 : vector<8xf32> to vector<8x1xf32>
    %cst_16 = arith.constant dense<0.000000e+00> : vector<8xf32>
    %32 = vector.multi_reduction <add>, %29, %cst_16 [1] : vector<8x64xf32> to vector<8xf32>
    %33 = vector.shape_cast %32 : vector<8xf32> to vector<8x1xf32>
    %c0_17 = arith.constant 0 : index
    %c0_18 = arith.constant 0 : index
    %34 = vector.load %arg6[%c0_17, %c0_18] : memref<8x1xf32, #tpu.memory_space<vmem>>, vector<8x1xf32>
    %35 = arith.subf %14, %18 : vector<8x1xf32>
    %36 = math.exp %35 : vector<8x1xf32>
    %37 = arith.mulf %34, %36 : vector<8x1xf32>
    %38 = arith.addf %37, %33 : vector<8x1xf32>
    %c0_19 = arith.constant 0 : index
    %c0_20 = arith.constant 0 : index
    %39 = vector.load %arg6[%c0_19, %c0_20] : memref<8x1xf32, #tpu.memory_space<vmem>>, vector<8x1xf32>
    tpu.vector_store %arg6[%c0_19, %c0_20], %38 {strides = array<i32>} : memref<8x1xf32, #tpu.memory_space<vmem>>, vector<8x1xf32>,
    %c0_21 = arith.constant 0 : index
    %c0_22 = arith.constant 0 : index
    %40 = vector.load %arg8[%c0_21, %c0_22] : memref<8x1xf32, #tpu.memory_space<vmem>>, vector<8x1xf32>
    %41 = arith.subf %15, %21 : vector<8x1xf32>
    %42 = math.exp %41 : vector<8x1xf32>
    %43 = arith.mulf %40, %42 : vector<8x1xf32>
    %44 = arith.subf %31, %33 : vector<8x1xf32>
    %45 = arith.addf %43, %44 : vector<8x1xf32>
    %c0_23 = arith.constant 0 : index
    %c0_24 = arith.constant 0 : index
    %46 = vector.load %arg8[%c0_23, %c0_24] : memref<8x1xf32, #tpu.memory_space<vmem>>, vector<8x1xf32>
    tpu.vector_store %arg8[%c0_23, %c0_24], %45 {strides = array<i32>} : memref<8x1xf32, #tpu.memory_space<vmem>>, vector<8x1xf32>,
    %c0_25 = arith.constant 0 : index
    %c0_26 = arith.constant 0 : index
    %47 = vector.load %arg5[%c0_25, %c0_26] : memref<8x1xf32, #tpu.memory_space<vmem>>, vector<8x1xf32>
    tpu.vector_store %arg5[%c0_25, %c0_26], %18 {strides = array<i32>} : memref<8x1xf32, #tpu.memory_space<vmem>>, vector<8x1xf32>,
    %c0_27 = arith.constant 0 : index
    %c0_28 = arith.constant 0 : index
    %48 = vector.load %arg7[%c0_27, %c0_28] : memref<8x1xf32, #tpu.memory_space<vmem>>, vector<8x1xf32>
    tpu.vector_store %arg7[%c0_27, %c0_28], %21 {strides = array<i32>} : memref<8x1xf32, #tpu.memory_space<vmem>>, vector<8x1xf32>,
    %c0_i32_29 = arith.constant 0 : i32
    %49 = arith.cmpi eq, %arg1, %c0_i32_29 : i32
    %50 = arith.extui %49 : i1 to i32
    %c0_i32_30 = arith.constant 0 : i32
    %51 = arith.cmpi ne, %50, %c0_i32_30 : i32
    scf.if %51 {
      %c0_31 = arith.constant 0 : index
      %c0_32 = arith.constant 0 : index
      %52 = vector.load %arg5[%c0_31, %c0_32] : memref<8x1xf32, #tpu.memory_space<vmem>>, vector<8x1xf32>
      %c0_33 = arith.constant 0 : index
      %c0_34 = arith.constant 0 : index
      %53 = vector.load %arg6[%c0_33, %c0_34] : memref<8x1xf32, #tpu.memory_space<vmem>>, vector<8x1xf32>
      %54 = math.log %53 : vector<8x1xf32>
      %55 = arith.addf %52, %54 : vector<8x1xf32>
      %c0_35 = arith.constant 0 : index
      %c0_36 = arith.constant 0 : index
      %56 = vector.load %arg7[%c0_35, %c0_36] : memref<8x1xf32, #tpu.memory_space<vmem>>, vector<8x1xf32>
      %57 = arith.addf %55, %56 : vector<8x1xf32>
      %c0_37 = arith.constant 0 : index
      %c0_38 = arith.constant 0 : index
      %58 = vector.load %arg8[%c0_37, %c0_38] : memref<8x1xf32, #tpu.memory_space<vmem>>, vector<8x1xf32>
      %59 = math.log %58 : vector<8x1xf32>
      %60 = arith.addf %57, %59 : vector<8x1xf32>
      %61 = vector.shape_cast %60 : vector<8x1xf32> to vector<1x8x1xf32>
      %cst_39 = arith.constant dense<0.000000e+00> : vector<1xf32>
      %62 = vector.multi_reduction <add>, %61, %cst_39 [1, 2] : vector<1x8x1xf32> to vector<1xf32>
      %63 = vector.shape_cast %62 : vector<1xf32> to vector<1x1x1xf32>
      %64 = vector.extract %63[0, 0, 0] : f32 from vector<1x1x1xf32>
      %65 = vector.broadcast %64 : f32 to vector<1x8x128xf32>
      %c0_40 = arith.constant 0 : index
      %c0_41 = arith.constant 0 : index
      %c0_42 = arith.constant 0 : index
      %66 = vector.load %arg4[%c0_40, %c0_41, %c0_42] : memref<1x8x128xf32, #tpu.memory_space<vmem>>, vector<1x8x128xf32>
      tpu.vector_store %arg4[%c0_40, %c0_41, %c0_42], %65 {strides = array<i32>} : memref<1x8x128xf32, #tpu.memory_space<vmem>>, vector<1x8x128xf32>,
    } else {
    }
    return
  }
  func.func @transform_0(%arg0: i32, %arg1: i32) -> (i32, i32) {
    %c0_i32 = arith.constant 0 : i32
    return %arg0, %arg1 : i32, i32
  }
  func.func @transform_1(%arg0: i32, %arg1: i32) -> (i32, i32) {
    %c0_i32 = arith.constant 0 : i32
    return %arg0, %arg1 : i32, i32
  }
  func.func @transform_2(%arg0: i32, %arg1: i32) -> (i32, i32, i32) {
    %c0_i32 = arith.constant 0 : i32
    %c0_i32_0 = arith.constant 0 : i32
    %c0_i32_1 = arith.constant 0 : i32
    return %arg0, %c0_i32, %c0_i32_0 : i32, i32, i32
  }
}

</mosaic_0001>

<bundles_post_ra>
// kernel: tpu_custom_call.1
= control target key start
LH: loop header
LB: loop body
LE: loop exit
PB: predicated region body
PF: predicated region fallthrough
CT: control target
= control target key end

     0   :  { %7 = vsyncpa [#allocation7], 0  ;;  %s937_s0 = inlined_call_operand.hbm [shape: f32[16,64], index: 0, kind: input, shape index: {}]   ;;  %s938_s1 = inlined_call_operand.hbm [shape: f32[16,64], index: 1, kind: input, shape index: {}]   ;;  %s939_s2 = inlined_call_operand.hbm [shape: f32[2,8,128], index: 2, kind: output, shape index: {}]  }
   0x1   :  { %9 = vsyncpa [#allocation7 + $0x1], 0 }
   0x2   :  { %10 = vsyncpa [#allocation10], 0 }
   0x3   :  { %12 = vsyncpa [#allocation10 + $0x1], 0 }
   0x4   :  { %13 = vsyncpa [#allocation8], 0 }
   0x5   :  { %15 = vsyncpa [#allocation8 + $0x1], 0  ;;  %s695_s9 = smov 0   ;;  %s697_s10 = smov 0  }
   0x6   :  { %s699_s11 = smov 0   ;;  %s701_s12 = smov 0  }
   0x7   :  { %s703_s13 = smov 0   ;;  %s705_s14 = smov 0  }
   0x8 LB: > { %s424_s15 = sadd.s32 4294967295, %s671_s14   ;;  %s425_s16 = sadd.s32 4294967294, %s671_s14   ;;  %s671_s14 = sphi %s705_s14, %s21_s14   ;;  %s667_s13 = sphi %s703_s13, %s959_s13   ;;  %s663_s12 = sphi %s701_s12, %s958_s12   ;;  %s659_s11 = sphi %s699_s11, %s957_s11   ;;  %s655_s10 = sphi %s697_s10, %s956_s10   ;;  %s651_s9 = sphi %s695_s9, %s955_s9  }
   0x9   : > { %s33_s17 = sadd.s32 1, %s667_s13  ;;  %s42_s18 = sadd.s32 1, %s659_s11 }
   0xa   : > { %p35_p0 = scmp.ge.s32.totalorder %s33_s17, 2  ;;  %p49_p1 = scmp.ne.s32.totalorder %s659_s11, %s655_s10 }
   0xb   : > { %p50_p2 = scmp.eq.s32.totalorder %s671_s14, 0  ;;  %p55_p3 = scmp.ne.s32.totalorder %s655_s10, %s651_s9 }
   0xc   : > { %s961_s17 = smov (%p35_p0, %s33_s17), 0  ;;  %p56_p5 = scmp.eq.s32.totalorder %s424_s15, 0 }
   0xd   : > { %p736_p4 = por %p50_p2, %p49_p1  ;;  %s37_s20 = ssub.s32 %s667_s13, %s961_s17 }
   0xe   : > { %p107_p6 = scmp.eq.s32.totalorder %s424_s15, 1  ;;  %p40_p7 = scmp.eq.s32.totalorder %s37_s20, 0 }
   0xf   : > { %p742_p8 = por %p56_p5, %p55_p3  ;;  %p113_p10 = scmp.eq.s32.totalorder %s425_s16, 1 }
  0x10   : > { %p746_p9 = por %p107_p6, %p49_p1  ;;  %p459_p13 = scmp.lt.s32.totalorder %s671_s14, 2 }
  0x11   : > { %s943_s21 = scalar_select %p742_p8, 1, 0 }
  0x12   : > { %s944_s22 = scalar_select %p746_p9, 1, 0 }
  0x13   : > { %s751_s23 = scalar_select %p40_p7, %s659_s11, %s42_s18  }
  0x14   : > { %p753_p11 = por %p113_p10, %p55_p3  ;;  %s760_s25 = sand.u32 1, %s659_s11  }
  0x15   : > { %s428_s26 = sshll.u32 %s760_s25, 3  ;;  %s429_s27 = sshll.u32 %s667_s13, 7 }
  0x16   : > { %s945_s24 = scalar_select %p753_p11, 1, 0 }
  0x17   : > { %s769_s30 = scalar_lea.hbm %s937_s0, %s429_s27  ;;  %s137_s3 = scalar_lea.vmem [#allocation6], %s428_s26 }
  0x18   : > { %s145_s4 = sshll.u32 %s137_s3, 4  ;;  %p777_p0 = pnand %p459_p13, %p736_p4  ;;  %s773_s4 = int_to_ptr.vmem [resolvable:$true] %s145_s4 }
  0x19   : > { %s134_s6 = scalar_lea.sflag [#allocation7], %s760_s25  ;;  %s525_s7 = scalar_lea.hbm %s769_s30, 128 }
  0x1a   : > { %p526_p3 = scmp.ne.s32.totalorder %s769_s30, %s525_s7  ;;  %p527_p5 = pneg %p777_p0 }
  0x1b   : > { %s530_s16 = scalar_lea.hbm %s937_s0, 256  ;;  %p531_p4 = scmp.lt.u32.totalorder %s769_s30, %s937_s0 }
  0x1c   : > { %p528_p6 = pnand %p527_p5, %p526_p3  ;;  %p532_p10 = scmp.lt.u32.totalorder %s530_s16, %s525_s7 }
  0x1d   : > { %p534_p12 = scmp.lt.u32.totalorder %s525_s7, %s769_s30 }
  0x1e   : > { %p529_p7 = pneg %p528_p6  ;;  %p533_p13 = por %p532_p10, %p531_p4 }
  0x20   : > { %p535_p1 = por %p534_p12, %p533_p13 }
  0x22   : > { %p536_p2 = pnand %p535_p1, %p529_p7 }
  0x24   : > { %539 = shalt.err (!%p536_p2)
}
  0x25   : > { %s540_s20 = scalar_lea.vmem %s773_s4, 128  ;;  %s673_s28 = smov [#allocation6]  }
  0x26   : > { %p541_p3 = scmp.ne.s32.totalorder %s773_s4, %s540_s20  ;;  %s545_s29 = sshll.u32 %s673_s28, 4  ;;  %s546_s29 = int_to_ptr.vmem [resolvable:$false] %s545_s29 }
  0x27   : > { %s547_s3 = scalar_lea.vmem %s546_s29, 256  ;;  %p548_p9 = scmp.lt.s32.totalorder %s773_s4, %s546_s29 }
  0x28   : > { %p543_p6 = pnand %p541_p3, %p527_p5  ;;  %p549_p4 = scmp.lt.s32.totalorder %s547_s3, %s540_s20 }
  0x2a   : > { %p544_p11 = pneg %p543_p6  ;;  %p550_p10 = por %p549_p4, %p548_p9 }
  0x2c   : > { %p551_p12 = pnand %p550_p10, %p544_p11 }
  0x2e   : > { %554 = shalt.err (!%p551_p12)
}
  0x2f   : > { %451 = dma.hbm_to_vmem [thread:$0]  (!%p777_p0), %s769_s30, 128, %s773_s4, %s134_s6  }
  0x30   : > { %p947_p1 = scmp.lt.s32.totalorder %s671_s14, 3  ;;  %p948_p2 = scmp.ge.s32.totalorder %s671_s14, 1 }
  0x31   : > { %s822_s16 = scalar_lea.hbm %s938_s1, %s429_s27  ;;  %s156_s18 = scalar_lea.vmem [#allocation9], %s428_s26 }
  0x32   : > { %p813_p7 = pnand %p948_p2, %p947_p1  ;;  %s164_s19 = sshll.u32 %s156_s18, 4  ;;  %s165_s19 = int_to_ptr.vmem [resolvable:$true] %s164_s19 }
  0x33   : > { %s153_s30 = scalar_lea.sflag [#allocation10], %s760_s25  ;;  %s555_s4 = scalar_lea.hbm %s822_s16, 128 }
  0x34   : > { %s949_s7 = scalar_select %p813_p7, 1, 0 }
  0x35   : > { %p556_p9 = scmp.ne.s32.totalorder %s822_s16, %s555_s4  ;;  %s560_s27 = scalar_lea.hbm %s938_s1, 256 }
  0x36   : > { %p561_p3 = scmp.lt.u32.totalorder %s822_s16, %s938_s1  ;;  %p562_p6 = scmp.lt.u32.totalorder %s560_s27, %s555_s4 }
  0x37   : > { %p558_p11 = pnand %p556_p9, %p527_p5  ;;  %p564_p10 = scmp.lt.u32.totalorder %s555_s4, %s822_s16 }
  0x38   : > { %p563_p4 = por %p562_p6, %p561_p3 }
  0x39   : > { %p559_p13 = pneg %p558_p11 }
  0x3a   : > { %p565_p12 = por %p564_p10, %p563_p4 }
  0x3c   : > { %p566_p1 = pnand %p565_p12, %p559_p13 }
  0x3e   : > { %569 = shalt.err (!%p566_p1)
}
  0x3f   : > { %s570_s25 = scalar_lea.vmem %s165_s19, 128  ;;  %s674_s26 = smov [#allocation9]  }
  0x40   : > { %p571_p2 = scmp.ne.s32.totalorder %s165_s19, %s570_s25  ;;  %s575_s3 = sshll.u32 %s674_s26, 4  ;;  %s576_s3 = int_to_ptr.vmem [resolvable:$false] %s575_s3 }
  0x41   : > { %s577_s8 = scalar_lea.vmem %s576_s3, 256  ;;  %p578_p8 = scmp.lt.s32.totalorder %s165_s19, %s576_s3 }
  0x42   : > { %p573_p9 = pnand %p571_p2, %p527_p5  ;;  %p579_p7 = scmp.lt.s32.totalorder %s577_s8, %s570_s25 }
  0x44   : > { %p574_p11 = pneg %p573_p9  ;;  %p580_p3 = por %p579_p7, %p578_p8 }
  0x46   : > { %p581_p6 = pnand %p580_p3, %p574_p11 }
  0x48   : > { %584 = shalt.err (!%p581_p6)
}
  0x49   : > { %454 = dma.hbm_to_vmem [thread:$0]  (!%p777_p0), %s822_s16, 128, %s165_s19, %s153_s30  }
  0x4a   : > { %p950_p13 = scmp.ne.s32.totalorder %s949_s7, 0 }
  0x4b   : > { %s849_s15 = sand.u32 (!%p950_p13), 1, %s655_s10   ;;  %p951_p8 = scmp.ne.s32.totalorder (!%p950_p13), %s943_s21, 0 }
  0x4c   : > { %173 = sbr.rel (%p950_p13) target bundleno = 776 (0x308), region = 28  ;;  %s852_s18 = sshll.u32 (!%p950_p13), %s849_s15, 3 }
  0x4d   : > { %s176_s4 = scalar_lea.sflag (!%p950_p13), [#allocation7], %s849_s15  ;;  %s179_s6 = scalar_lea.vmem (!%p950_p13), [#allocation6], %s852_s18 }
  0x53   : > { %638 = dma.done.wait (%p951_p8), %s176_s4, 128  }
  0x54   : > { %640 = vsyncadd (%p951_p8), %s176_s4, 4294967168  ;;  %s185_s5 = scalar_lea.sflag [#allocation10], %s849_s15  ;;  %s188_s7 = scalar_lea.vmem [#allocation9], %s852_s18 }
  0x55   : > { %642 = dma.done.wait (%p951_p8), %s185_s5, 128  }
  0x56   : > { %644 = vsyncadd (%p951_p8), %s185_s5, 4294967168  ;;  %vm218_vm0 = vcmask 7168   ;;  %v675_v0 = vmov 0.0   ;;  %v223_v1 = vld [vmem:[%s179_s6] sm:$0xff]  ;;  %v224_v2 = vld [vmem:[%s188_s7] sm:$0xff]  ;;  %vm232_vm2 = vcmask 523264  }
  0x57   : > { %219 = vst.msk [vmem:[#allocation2] sm:$0xff] %vm218_vm0, %v675_v0  ;;  %221 = vst.msk [vmem:[#allocation4] sm:$0xff] %vm218_vm0, %v675_v0  ;;  %vm225_vm1 = vcmp.gt.f32.partialorder %v224_v2, 0.5  ;;  %v227_v3 = vsub.f32 0.0, %v223_v1  ;;  %vm676_vm3 = vmmov 1   ;;  %v677_v8 = vmov 0  }
  0x58   : > { %vm226_vm4 = vmxor %vm225_vm1, %vm676_vm3  ;;  %513 = vset.pattern.permute.xlu1 %v677_v8  ;;  %514 = vset.pattern.permute.xlu0 %v677_v8  ;;  %v678_v9 = vmov 1.0   ;;  %s213_s21 = scalar_lea.vmem [#allocation11], %s852_s18  ;;  %s437_s19 = sshll.u32 %s663_s12, 7 }
  0x59   : > { %v228_v4 = vsel %vm225_vm1, %v227_v3, -1e+12  ;;  %v229_v5 = vsel %vm226_vm4, %v223_v1, -1e+12  ;;  %220 = vst.msk [vmem:[#allocation3] sm:$0xff] %vm218_vm0, %v678_v9  ;;  %222 = vst.msk [vmem:[#allocation5] sm:$0xff] %vm218_vm0, %v678_v9  ;;  %s890_s28 = scalar_lea.hbm %s939_s2, %s437_s19 }
  0x5a   : > { %v233_v6 = vsel %vm232_vm2, %v228_v4, -inf  ;;  %v237_v7 = vsel %vm232_vm2, %v229_v5, -inf  ;;  %s321_s16 = sshll.u32 %s213_s21, 4  ;;  %s308_s29 = scalar_lea.sflag [#allocation8], %s849_s15  ;;  %s885_s16 = int_to_ptr.vmem [resolvable:$true] %s321_s16 }
  0x5b   : > { %234 = vmax.xlane.f32.xlu0 %v233_v6  ;;  %s585_s25 = scalar_lea.vmem %s885_s16, 128  ;;  %p952_p5 = scmp.ne.s32.totalorder %s944_s22, 0 }
  0x5c   : > { %p586_p0 = scmp.ne.s32.totalorder %s885_s16, %s585_s25  ;;  %s679_s12 = smov [#allocation11]  }
  0x5d   : > { %s589_s26 = sshll.u32 %s679_s12, 4  ;;  %s590_s26 = int_to_ptr.vmem [resolvable:$false] %s589_s26 }
  0x5e   : > { %v230_v10 = vld [vmem:[#allocation2] sm:$0xff]  ;;  %v231_v13 = vld [vmem:[#allocation4] sm:$0xff]  ;;  %p587_p7 = pnand %p586_p0, %p952_p5  ;;  %s591_s3 = scalar_lea.vmem %s590_s26, 256 }
  0x5f   : > { %238 = vmax.xlane.f32.xlu0 %v237_v7  ;;  %p592_p10 = scmp.lt.s32.totalorder %s885_s16, %s590_s26  ;;  %p593_p12 = scmp.lt.s32.totalorder %s591_s3, %s585_s25 }
  0x60   : > { %v263_v31 = vld [vmem:[#allocation3] sm:$0xff]  ;;  %v271_v33 = vld [vmem:[#allocation5] sm:$0xff]  ;;  %p588_p4 = pneg %p587_p7 }
  0x61   : > { %p594_p1 = por %p593_p12, %p592_p10 }
  0x63   : > { %p595_p2 = pnand %p594_p1, %p588_p4 }
  0xe8   : > { %v235_v11 = vpop.xlane.xlu0 %234 }
  0xe9   : > { %v236_v12 = vmax.f32 %v230_v10, %v235_v11 }
  0xeb   : > { %v264_v14 = vsub.f32 %v230_v10, %v236_v12  ;;  %279 = vst.msk [vmem:[#allocation2] sm:$0xff] %vm218_vm0, %v236_v12  ;;  %243 = vperm.xlu1 %513, %v236_v12  }
  0xec   : > { %v239_v15 = vpop.xlane.xlu0 %238 }
  0xed   : > { %v240_v16 = vmax.f32 %v231_v13, %v239_v15  ;;  %v265_v28 = vmul.f32 1.442695, %v264_v14 }
  0xef   : > { %v272_v17 = vsub.f32 %v231_v13, %v240_v16  ;;  %280 = vst.msk [vmem:[#allocation4] sm:$0xff] %vm218_vm0, %v240_v16  ;;  %249 = vperm.xlu1 %513, %v240_v16  }
  0xf1   : > { %v273_v29 = vmul.f32 1.442695, %v272_v17 }
  0xf2   : > { %v284_v46 = vld [vmem:[#allocation2] sm:$0xff] }
  0xf6   : > { %v289_v48 = vld [vmem:[#allocation4] sm:$0xff] }
 0x16a   : > { %v244_v18 = vpop.permute.xlu1 %243 }
 0x16b   : > { %v246_v20 = vsub.f32 %v227_v3, %v244_v18 }
 0x16e   : > { %v250_v19 = vpop.permute.xlu1 %249 }
 0x16f   : > { %v252_v21 = vsub.f32 %v223_v1, %v250_v19 }
 0x171   : > { %v253_v22 = vsel %vm225_vm1, %v246_v20, %v252_v21 }
 0x172   : > { %v254_v23 = vmul.f32 1.442695, %v253_v22 }
 0x174   : > { %515 = vpow2.f32 %v254_v23 }
 0x175   : > { %517 = vpow2.f32 %v265_v28 }
 0x176   : > { %519 = vpow2.f32 %v273_v29 }
 0x17e   : > { %v516_v24 = vpop.eup %515 }
 0x17f   : > { %v257_v25 = vsel %vm232_vm2, %v516_v24, 0.0  ;;  %v256_v26 = vsel %vm225_vm1, %v516_v24, 0.0  ;;  %v518_v30 = vpop.eup %517 }
 0x180   : > { %258 = vadd.xlane.f32.xlu1 %v257_v25  ;;  %v260_v27 = vsel %vm232_vm2, %v256_v26, 0.0  ;;  %v520_v32 = vpop.eup %519  ;;  %v267_v35 = vmul.f32 %v518_v30, %v263_v31 }
 0x181   : > { %261 = vadd.xlane.f32.xlu0 %v260_v27  ;;  %v275_v37 = vmul.f32 %v520_v32, %v271_v33 }
 0x20d   : > { %v259_v34 = vpop.xlane.xlu1 %258 }
 0x20e   : > { %v262_v36 = vpop.xlane.xlu0 %261 }
 0x20f   : > { %v268_v38 = vadd.f32 %v267_v35, %v262_v36  ;;  %v276_v39 = vsub.f32 %v259_v34, %v262_v36 }
 0x211   : > { %270 = vst.msk [vmem:[#allocation3] sm:$0xff] %vm218_vm0, %v268_v38  ;;  %v277_v40 = vadd.f32 %v276_v39, %v275_v37 }
 0x213   : > { %278 = vst.msk [vmem:[#allocation5] sm:$0xff] %vm218_vm0, %v277_v40 }
 0x218   : > { %v285_v41 = vld [vmem:[#allocation3] sm:$0xff] }
 0x219   : > { %521 = vlog2.f32 %v285_v41 }
 0x21a   : > { %v291_v42 = vld [vmem:[#allocation5] sm:$0xff] }
 0x21b   : > { %523 = vlog2.f32 %v291_v42 }
 0x223   : > { %v522_v43 = vpop.eup %521 }
 0x224   : > { %v287_v44 = vmul.f32 0.6931472, %v522_v43 }
 0x225   : > { %v524_v45 = vpop.eup %523 }
 0x226   : > { %v288_v47 = vadd.f32 %v287_v44, %v284_v46  ;;  %v293_v50 = vmul.f32 0.6931472, %v524_v45 }
 0x228   : > { %v290_v49 = vadd.f32 %v289_v48, %v288_v47 }
 0x22a   : > { %v294_v51 = vadd.f32 %v293_v50, %v290_v49 }
 0x22c   : > { %v295_v52 = vsel %vm218_vm0, %v294_v51, 0.0 }
 0x22d   : > { %296 = vadd.xlane.f32.xlu0 %v295_v52 }
 0x2ba   : > { %v297_v53 = vpop.xlane.xlu0 %296 }
 0x2bb   : > { %v298_v54 = vrot.slane %v297_v53, 4 }
 0x2bd   : > { %v299_v55 = vadd.f32 %v298_v54, %v297_v53 }
 0x2bf   : > { %v300_v56 = vrot.slane %v299_v55, 2 }
 0x2c1   : > { %v301_v57 = vadd.f32 %v300_v56, %v299_v55 }
 0x2c3   : > { %v302_v58 = vrot.slane %v301_v57, 1 }
 0x2c5   : > { %v303_v59 = vadd.f32 %v302_v58, %v301_v57 }
 0x2c7   : > { %440 = vpush %v303_v59 }
 0x2f8   : > { %s441_s30 = spop %440 }
 0x2f9   : > { %v305_v60 = vstv %s441_s30 }
 0x2fa   : > { %306 = vst [vmem:[%s213_s21] sm:$0xff] %v305_v60 }
 0x2fb   : > { %598 = shalt.err (!%p595_p2)
}
 0x2fc   : > { %s599_s8 = scalar_lea.hbm %s890_s28, 128  ;;  %s603_s4 = scalar_lea.hbm %s939_s2, 256 }
 0x2fd   : > { %p600_p9 = scmp.ne.s32.totalorder %s890_s28, %s599_s8  ;;  %p604_p6 = scmp.lt.u32.totalorder %s890_s28, %s939_s2 }
 0x2fe   : > { %p605_p13 = scmp.lt.u32.totalorder %s603_s4, %s599_s8  ;;  %p607_p0 = scmp.lt.u32.totalorder %s599_s8, %s890_s28 }
 0x2ff   : > { %p601_p11 = pnand %p600_p9, %p952_p5 }
 0x300   : > { %p606_p8 = por %p605_p13, %p604_p6 }
 0x301   : > { %p602_p3 = pneg %p601_p11 }
 0x302   : > { %p608_p7 = por %p607_p0, %p606_p8 }
 0x304   : > { %p609_p4 = pnand %p608_p7, %p602_p3 }
 0x306   : > { %612 = shalt.err (!%p609_p4)
}
 0x307   : > { %446 = dma.vmem_to_hbm [thread:$0]  (%p952_p5), %s885_s16, 128, %s890_s28, %s308_s29  }
 0x308 PF: > { %s333_s7 = sand.u32 1, %s651_s9   ;;  %p953_p10 = scmp.ne.s32.totalorder %s945_s24, 0 }
 0x309   : > { %p954_p12 = scmp.ge.s32.totalorder %s671_s14, 2  ;;  %s334_s21 = scalar_lea.sflag [#allocation8], %s333_s7 }
 0x30b   : > { %p456_p1 = pnand %p954_p12, %p953_p10 }
 0x30d   : > { %646 = dma.done.wait (!%p456_p1), %s334_s21, 128  }
 0x30e   : > { %648 = vsyncadd (!%p456_p1), %s334_s21, 4294967168  ;;  %s21_s14 = sadd.s32 1, %s671_s14   ;;  %s955_s9 = smov %s655_s10 }
 0x30f   : > { %p18_p2 = scmp.ge.s32.totalorder %s21_s14, 4   ;;  %s956_s10 = smov %s659_s11 }
 0x310   : > { %s957_s11 = smov %s751_s23  ;;  %s958_s12 = smov %s667_s13 }
 0x311   : > { %s959_s13 = smov %s961_s17  ;;  %20 = sbr.rel (!%p18_p2) target bundleno = 8 (0x8), region = 94 }
 0x318   :  { %339 = vsyncpa [#allocation7], 1 }
 0x319   :  { %341 = vsyncpa [#allocation7 + $0x1], 1 }
 0x31a   :  { %342 = vsyncpa [#allocation10], 1 }
 0x31b   :  { %344 = vsyncpa [#allocation10 + $0x1], 1 }
 0x31c   :  { %345 = vsyncpa [#allocation8], 1 }
 0x31d   :  { %347 = vsyncpa [#allocation8 + $0x1], 1 }

</bundles_post_ra>
